<compile_context>
chip_gen: v5e
topology: v5e:2x2
jax: 0.10.0
libtpu: 0.0.40
codegen_flags: <defaults>
</compile_context>

<pallas_src>
import jax
import jax.numpy as jnp
from jax.experimental import pallas as pl
from jax.experimental.pallas import tpu as pltpu


def _h_swish_kernel(x_ref, o_ref):
    # h_swish(x) = x * relu6(x + 3) / 6  ==  x * clip(x/6 + 0.5, 0, 1)
    # Compute in the native dtype (bf16 VPU on v6e/v7x; mem-bound everywhere).
    x = x_ref[...]
    hs = jnp.clip(x * (1.0 / 6.0) + 0.5, 0.0, 1.0)
    o_ref[...] = (x * hs).astype(o_ref.dtype)


def _h_swish_math(x):
    # Plain-jnp path for tiny tails / degenerate inputs (same formulation).
    return x * jnp.clip(x * (1.0 / 6.0) + 0.5, 0.0, 1.0)


def _is_v7x() -> bool:
    try:
        return "v7" in jax.devices()[0].device_kind.lower()
    except Exception:
        return False


def _default_tile_bytes() -> int:
    # ~0.35 us/grid-step overhead is a bigger relative tax on v7x (3.2 TB/s),
    # so use larger tiles there; 4 MiB is the sweet spot on v5e/v6e.
    return (8 if _is_v7x() else 4) * 1024 * 1024


def _vmem_limit_bytes() -> int:
    # 2 arrays x 2 buffers x tile must fit with headroom.
    return (48 if _is_v7x() else 32) * 1024 * 1024


def _h_swish_2d(x2d: jax.Array, target_tile_bytes: int, pack: int) -> jax.Array:
    rows, lane = x2d.shape
    dtype = x2d.dtype
    itemsize = jnp.dtype(dtype).itemsize

    # Rows per tile ~ target_tile_bytes, rounded to the sublane packing multiple.
    block_rows = max(pack, (target_tile_bytes // (lane * itemsize)) // pack * pack)
    if rows <= block_rows:
        block_rows = rows  # full extent along rows is always a legal block dim

    grid = (pl.cdiv(rows, block_rows),)

    return pl.pallas_call(
        _h_swish_kernel,
        out_shape=jax.ShapeDtypeStruct((rows, lane), dtype),
        grid_spec=pltpu.PrefetchScalarGridSpec(
            num_scalar_prefetch=0,
            grid=grid,
            in_specs=[pl.BlockSpec((block_rows, lane), lambda i: (i, 0))],
            out_specs=pl.BlockSpec((block_rows, lane), lambda i: (i, 0)),
        ),
        compiler_params=pltpu.CompilerParams(
            # "parallel" lets megacore shard the row axis across both TCs on v7x.
            dimension_semantics=("parallel",),
            vmem_limit_bytes=_vmem_limit_bytes(),
        ),
        cost_estimate=pl.CostEstimate(
            flops=4 * rows * lane,
            transcendentals=0,
            bytes_accessed=2 * rows * lane * itemsize,
        ),
    )(x2d)


def h_swish(x: jax.Array, *, target_tile_bytes: int | None = None) -> jax.Array:
    """Elementwise h_swish on an arbitrary-shape (e.g. NCHW) tensor via Pallas."""
    orig_shape = x.shape
    dtype = x.dtype
    itemsize = jnp.dtype(dtype).itemsize
    total = x.size

    if total == 0:
        return x

    if target_tile_bytes is None:
        target_tile_bytes = _default_tile_bytes()

    # Sublane packing multiple: f32 -> 8, bf16/f16 -> 16, int8/fp8 -> 32.
    pack = max(8, 32 // itemsize)

    # Widest lane dimension (multiple of 128) dividing the flat size -> no
    # wrapper-side padding on the common path.
    # TODO(synk): if h_swish is ever applied to a non-default-layout intermediate,
    # build the BlockSpec over the original N-D shape instead of flattening to
    # avoid an XLA relayout copy.
    lane = None
    for c in (4096, 2048, 1024, 512, 256, 128):
        if total % c == 0:
            lane = c
            break

    x_flat = jnp.ravel(x)

    if lane is None:
        # Non-128-divisible fallback: Pallas over the 128-aligned prefix, plain
        # jnp over the <=127-element tail. Avoids full-array pad + slice copies.
        lane = 128
        rows = total // lane
        if rows == 0:
            # Fewer than 128 elements total: not worth a kernel launch.
            return _h_swish_math(x_flat).astype(dtype).reshape(orig_shape)
        prefix = rows * lane
        y_prefix = _h_swish_2d(
            x_flat[:prefix].reshape(rows, lane), target_tile_bytes, pack
        ).reshape(-1)
        y_tail = _h_swish_math(x_flat[prefix:]).astype(dtype)
        return jnp.concatenate([y_prefix, y_tail]).reshape(orig_shape)

    rows = total // lane
    y2d = _h_swish_2d(x_flat.reshape(rows, lane), target_tile_bytes, pack)
    return y2d.reshape(orig_shape)


if __name__ == "__main__":
    key = jax.random.PRNGKey(0)

    def ref_fn(x):
        # Literal module formula: x * relu6(x + 3) / 6
        return x * (jnp.clip(x + 3.0, 0.0, 6.0) / 6.0)

    # NCHW input consistent with the module: batch=2, channels=4, 16x16.
    x = jax.random.normal(key, (2, 4, 16, 16), dtype=jnp.float32) * 4.0
    y = jax.block_until_ready(h_swish(x))
    assert y.shape == x.shape and y.dtype == x.dtype
    assert jnp.allclose(y, ref_fn(x), atol=1e-5, rtol=1e-5)

    # bf16 path (native bf16 compute inside the kernel).
    xb = x.astype(jnp.bfloat16)
    yb = jax.block_until_ready(h_swish(xb))
    assert yb.shape == xb.shape and yb.dtype == xb.dtype
    assert jnp.allclose(
        yb.astype(jnp.float32), ref_fn(xb.astype(jnp.float32)), atol=3e-2, rtol=3e-2
    )

    # Odd-sized tensor exercises the prefix + tail fallback path.
    x2 = jax.random.normal(jax.random.PRNGKey(1), (2, 3, 7, 5), dtype=jnp.float32)
    y2 = jax.block_until_ready(h_swish(x2))
    assert y2.shape == x2.shape and jnp.allclose(y2, ref_fn(x2), atol=1e-5, rtol=1e-5)

    print("KERNEL_OK")
</pallas_src>

<mosaic_0001>
module attributes {stable_mosaic.version = 11 : i64} {
  func.func @_h_swish_kernel(%arg0: i32, %arg1: memref<1x2048xf32, #tpu.memory_space<vmem>>, %arg2: memref<1x2048xf32, #tpu.memory_space<vmem>>) attributes {dimension_semantics = [#tpu.dimension_semantics<parallel>], iteration_bounds = array<i64: 1>, scalar_prefetch = 0 : i64, scratch_operands = 0 : i64, tpu.core_type = #tpu.core_type<tc>, window_params = [{transform_indices = @transform_0, window_bounds = array<i64: 1, 2048>}, {transform_indices = @transform_1, window_bounds = array<i64: 1, 2048>}]} {
    %c0 = arith.constant 0 : index
    %c0_0 = arith.constant 0 : index
    %0 = vector.load %arg1[%c0, %c0_0] : memref<1x2048xf32, #tpu.memory_space<vmem>>, vector<1x2048xf32>
    %cst = arith.constant 0.166666672 : f32
    %1 = vector.broadcast %cst : f32 to vector<1x2048xf32>
    %2 = arith.mulf %0, %1 : vector<1x2048xf32>
    %cst_1 = arith.constant 5.000000e-01 : f32
    %3 = vector.broadcast %cst_1 : f32 to vector<1x2048xf32>
    %4 = arith.addf %2, %3 : vector<1x2048xf32>
    %cst_2 = arith.constant 0.000000e+00 : f32
    %cst_3 = arith.constant 1.000000e+00 : f32
    %5 = vector.broadcast %cst_2 : f32 to vector<1x2048xf32>
    %6 = arith.maximumf %5, %4 : vector<1x2048xf32>
    %7 = vector.broadcast %cst_3 : f32 to vector<1x2048xf32>
    %8 = arith.minimumf %7, %6 : vector<1x2048xf32>
    %9 = arith.mulf %0, %8 : vector<1x2048xf32>
    %c0_4 = arith.constant 0 : index
    %c0_5 = arith.constant 0 : index
    %10 = vector.load %arg2[%c0_4, %c0_5] : memref<1x2048xf32, #tpu.memory_space<vmem>>, vector<1x2048xf32>
    tpu.vector_store %arg2[%c0_4, %c0_5], %9 {strides = array<i32>} : memref<1x2048xf32, #tpu.memory_space<vmem>>, vector<1x2048xf32>,
    return
  }
  func.func @transform_0(%arg0: i32) -> (i32, i32) {
    %c0_i32 = arith.constant 0 : i32
    %c0_i32_0 = arith.constant 0 : i32
    return %arg0, %c0_i32 : i32, i32
  }
  func.func @transform_1(%arg0: i32) -> (i32, i32) {
    %c0_i32 = arith.constant 0 : i32
    %c0_i32_0 = arith.constant 0 : i32
    return %arg0, %c0_i32 : i32, i32
  }
}

</mosaic_0001>

<bundles_post_ra>
// kernel: tpu_custom_call.1
= control target key start
LH: loop header
LB: loop body
LE: loop exit
PB: predicated region body
PF: predicated region fallthrough
CT: control target
= control target key end

     0   :  { %6 = vsyncpa [#allocation3], 0  ;;  %s126_s0 = inlined_call_operand.hbm [shape: f32[1,2048], index: 0, kind: input, shape index: {}]   ;;  %s127_s1 = inlined_call_operand.hbm [shape: f32[1,2048], index: 1, kind: output, shape index: {}]  }
   0x1   :  { %7 = vsyncpa [#allocation4], 0  ;;  %s13_s8 = sshll.u32 %s126_s0, 4  ;;  %s108_s9 = smov [#allocation2]   ;;  %s14_s8 = int_to_ptr.hbm [resolvable:$true] %s13_s8 }
   0x2   :  { %s15_s10 = sshll.u32 %s108_s9, 4  ;;  %s16_s10 = int_to_ptr.vmem [resolvable:$true] %s15_s10 }
   0x3   :  { %18 = dma.hbm_to_vmem [thread:$0]  %s14_s8, 256, %s16_s10, [#allocation3]  }
   0x4   :  { %104 = dma.done.wait [#allocation3], 256  }
   0x5   :  { %105 = vsyncadd [#allocation3], 4294967040  ;;  %v23_v0 = vld [vmem:[#allocation2] sm:$0xff]  ;;  %v24_v1 = vld [vmem:[#allocation2 + $0x8] sm:$0xff]  ;;  %s109_s11 = smov [#allocation5]   ;;  %s44_s14 = sshll.u32 %s127_s1, 4  ;;  %s45_s14 = int_to_ptr.hbm [resolvable:$true] %s44_s14 }
   0x6   :  { %v25_v2 = vmul.f32 0.16666667, %v23_v0  ;;  %v26_v3 = vmul.f32 0.16666667, %v24_v1  ;;  %s42_s12 = sshll.u32 %s109_s11, 4  ;;  %s43_s12 = int_to_ptr.vmem [resolvable:$true] %s42_s12 }
   0x8   :  { %v27_v4 = vadd.f32 0.5, %v25_v2  ;;  %v28_v5 = vadd.f32 0.5, %v26_v3 }
   0xa   :  { %v29_v6 = vmax.f32 %v27_v4, 0.0  ;;  %v30_v7 = vmax.f32 %v28_v5, 0.0 }
   0xc   :  { %v31_v8 = vmin.f32 %v29_v6, 1.0  ;;  %v32_v9 = vmin.f32 %v30_v7, 1.0 }
   0xe   :  { %v33_v10 = vmul.f32 %v31_v8, %v23_v0  ;;  %v34_v11 = vmul.f32 %v32_v9, %v24_v1 }
  0x10   :  { %35 = vst [vmem:[#allocation5] sm:$0xff] %v33_v10 }
  0x11   :  { %36 = vst [vmem:[#allocation5 + $0x8] sm:$0xff] %v34_v11 }
  0x12   :  { %47 = dma.vmem_to_hbm [thread:$0]  %s43_s12, 256, %s45_s14, [#allocation4]  }
  0x13   :  { %106 = dma.done.wait [#allocation4], 256  }
  0x14   :  { %107 = vsyncadd [#allocation4], 4294967040 }
  0x15   :  { %52 = vsyncpa [#allocation3], 1 }
  0x16   :  { %53 = vsyncpa [#allocation4], 1 }

</bundles_post_ra>
